<compile_context>
chip_gen: v6e
topology: v6e:2x2x1
jax: 0.10.0
libtpu: 0.0.40
codegen_flags: <defaults>
</compile_context>

<pallas_src>
import jax
import jax.numpy as jnp
from jax.experimental import pallas as pl
from jax.experimental.pallas import tpu as pltpu


def _round_up(a, m):
    return ((a + m - 1) // m) * m


def mlp_ecg_kernel(x_ref, w1_ref, b1_ref, w2_ref, b2_ref, o_ref):
    # x arrives at its HBM dtype; pack to bf16 in-registers for the MXU
    # (VPU work, hidden under DMA/MXU).  Accumulate in f32.
    x = x_ref[...].astype(jnp.bfloat16)
    h = jnp.dot(x, w1_ref[...], preferred_element_type=jnp.float32)
    h = jnp.maximum(h + b1_ref[...], 0.0)              # bias + ReLU in f32
    out = jnp.dot(h.astype(jnp.bfloat16), w2_ref[...],
                  preferred_element_type=jnp.float32)
    o_ref[...] = (out + b2_ref[...]).astype(o_ref.dtype)


def mlp_ecg_forward(x, w1, b1, w2, b2, *, block_b=1024, out_dtype=jnp.float32):
    """x: (B, D) f32/bf16; w1: (D, H); b1: (H,); w2: (H, C); b2: (C,). Returns (B, C) f32.

    out_dtype=jnp.bfloat16 halves the padded (TB,128) writeback + re-read if
    bf16 logits are acceptable (they almost always are for 3 classes).
    """
    B, D = x.shape
    H = w1.shape[1]
    C = w2.shape[1]

    # Lane-dense classifier width (multiple of 128) -> unmasked full-lane vst.
    C_pad = max(128, _round_up(C, 128))

    # ---- Batch tiling ------------------------------------------------------
    if B < 8:
        # Block dim equal to the full array dim is always legal.
        TB = B
    else:
        # Big tiles to amortize per-step overhead, but >= 2 grid steps when the
        # batch allows so v7x's two TensorCores both get work ("parallel" axis).
        want_tiles = max(pl.cdiv(B, block_b), 2)
        TB = min(_round_up(pl.cdiv(B, want_tiles), 8), _round_up(block_b, 8))
    grid_b = pl.cdiv(B, TB)   # ragged last tile is masked by Pallas, no pad copy

    # ---- One-time (tiny) weight/bias prep ----------------------------------
    w1_bf16 = w1.astype(jnp.bfloat16)
    w2_bf16 = jnp.pad(w2, ((0, 0), (0, C_pad - C))).astype(jnp.bfloat16)
    b1_2d = b1.reshape(1, H).astype(jnp.float32)
    b2_2d = jnp.pad(b2, (0, C_pad - C)).reshape(1, C_pad).astype(jnp.float32)

    # ---- VMEM budget (only raise the scoped limit if we'd exceed default) ---
    x_bytes = jnp.dtype(x.dtype).itemsize
    o_bytes = jnp.dtype(out_dtype).itemsize
    vmem_bytes = (2 * TB * D * x_bytes          # double-buffered x tiles
                  + 2 * TB * C_pad * o_bytes    # double-buffered out tiles
                  + 2 * (D * H + H * C_pad) * 2  # bf16 weights (conservative 2x)
                  + 2 * (H + C_pad) * 4          # biases
                  + TB * H * (4 + 2))            # f32 hidden + bf16 copy
    vmem_limit = None
    if vmem_bytes > 30 * 1024 * 1024:
        vmem_limit = int(min(max(vmem_bytes * 1.25, 32 * 1024 * 1024),
                             64 * 1024 * 1024))   # stay under v7x physical VMEM

    # ---- Advisory cost estimate (matches the actual data path) --------------
    flops = 2 * B * D * H + 2 * B * H * C_pad
    bytes_accessed = (B * D * x_bytes
                      + (D * H + H * C_pad) * 2
                      + (H + C_pad) * 4
                      + B * C_pad * o_bytes)

    out_padded = pl.pallas_call(
        mlp_ecg_kernel,
        out_shape=jax.ShapeDtypeStruct((B, C_pad), out_dtype),
        grid_spec=pl.GridSpec(
            grid=(grid_b,),
            in_specs=[
                pl.BlockSpec((TB, D), lambda i: (i, 0)),      # x tile (pipelined)
                # Constant block index -> Mosaic keeps these resident and does
                # not re-fetch per step (second buffer is small: ~0.5 MiB).
                pl.BlockSpec((D, H), lambda i: (0, 0)),       # w1 resident
                pl.BlockSpec((1, H), lambda i: (0, 0)),       # b1 resident
                pl.BlockSpec((H, C_pad), lambda i: (0, 0)),   # w2 resident
                pl.BlockSpec((1, C_pad), lambda i: (0, 0)),   # b2 resident
            ],
            out_specs=pl.BlockSpec((TB, C_pad), lambda i: (i, 0)),
        ),
        compiler_params=pltpu.CompilerParams(
            dimension_semantics=("parallel",),
            vmem_limit_bytes=vmem_limit),
        cost_estimate=pl.CostEstimate(
            flops=flops, transcendentals=0, bytes_accessed=bytes_accessed),
    )(x, w1_bf16, b1_2d, w2_bf16, b2_2d)

    return out_padded[:B, :C].astype(jnp.float32)


def init_params(key, input_dim=768, hidden_dim=256, num_classes=3):
    """Deterministic init mimicking nn.Linear default: U(-1/sqrt(fan_in), 1/sqrt(fan_in))."""
    k1, k2, k3, k4 = jax.random.split(key, 4)
    bound1 = 1.0 / jnp.sqrt(jnp.float32(input_dim))
    bound2 = 1.0 / jnp.sqrt(jnp.float32(hidden_dim))
    # Stored already transposed relative to PyTorch's (out, in) convention.
    w1 = jax.random.uniform(k1, (input_dim, hidden_dim), jnp.float32, -bound1, bound1)
    b1 = jax.random.uniform(k2, (hidden_dim,), jnp.float32, -bound1, bound1)
    w2 = jax.random.uniform(k3, (hidden_dim, num_classes), jnp.float32, -bound2, bound2)
    b2 = jax.random.uniform(k4, (num_classes,), jnp.float32, -bound2, bound2)
    return w1, b1, w2, b2


if __name__ == "__main__":
    key = jax.random.PRNGKey(0)
    kx1, kx2, kp = jax.random.split(key, 3)

    D, H, C = 768, 256, 3
    w1, b1, w2, b2 = init_params(kp, D, H, C)

    def ref_f32(x):
        return jnp.maximum(x @ w1 + b1, 0.0) @ w2 + b2

    def ref_bf16(x):
        h = jnp.maximum(
            jnp.dot(x.astype(jnp.bfloat16), w1.astype(jnp.bfloat16),
                    preferred_element_type=jnp.float32) + b1, 0.0)
        return jnp.dot(h.astype(jnp.bfloat16), w2.astype(jnp.bfloat16),
                       preferred_element_type=jnp.float32) + b2

    # Case 1: tiny batch -> single tile whose batch dim equals the full dim.
    x_small = jax.random.normal(kx1, (4, D), jnp.float32)
    out_small = jax.block_until_ready(mlp_ecg_forward(x_small, w1, b1, w2, b2))
    assert out_small.shape == (4, C)
    assert jnp.allclose(out_small, ref_bf16(x_small), atol=1e-2, rtol=1e-2)
    assert jnp.allclose(out_small, ref_f32(x_small), atol=5e-2, rtol=5e-2)

    # Case 2: batch exercising a multi-step grid and a ragged (masked) last
    # tile: 36 rows -> two tiles of 24, no host-side padding copy of x.
    x_big = jax.random.normal(kx2, (36, D), jnp.float32)
    out_big = jax.block_until_ready(mlp_ecg_forward(x_big, w1, b1, w2, b2))
    assert out_big.shape == (36, C)
    assert jnp.allclose(out_big, ref_bf16(x_big), atol=1e-2, rtol=1e-2)
    assert jnp.allclose(out_big, ref_f32(x_big), atol=5e-2, rtol=5e-2)

    print("KERNEL_OK")
</pallas_src>

<mosaic_0001>
module attributes {stable_mosaic.version = 11 : i64} {
  func.func @mlp_ecg_kernel(%arg0: i32, %arg1: memref<4x768xf32, #tpu.memory_space<vmem>>, %arg2: memref<768x256xbf16, #tpu.memory_space<vmem>>, %arg3: memref<1x256xf32, #tpu.memory_space<vmem>>, %arg4: memref<256x128xbf16, #tpu.memory_space<vmem>>, %arg5: memref<1x128xf32, #tpu.memory_space<vmem>>, %arg6: memref<4x128xf32, #tpu.memory_space<vmem>>) attributes {dimension_semantics = [#tpu.dimension_semantics<parallel>], iteration_bounds = array<i64: 1>, scalar_prefetch = 0 : i64, scratch_operands = 0 : i64, tpu.core_type = #tpu.core_type<tc>, window_params = [{transform_indices = @transform_0, window_bounds = array<i64: 4, 768>}, {pipeline_mode = #tpu.pipeline_mode<synchronous>, transform_indices = @transform_1, window_bounds = array<i64: 768, 256>}, {pipeline_mode = #tpu.pipeline_mode<synchronous>, transform_indices = @transform_2, window_bounds = array<i64: 1, 256>}, {pipeline_mode = #tpu.pipeline_mode<synchronous>, transform_indices = @transform_3, window_bounds = array<i64: 256, 128>}, {pipeline_mode = #tpu.pipeline_mode<synchronous>, transform_indices = @transform_4, window_bounds = array<i64: 1, 128>}, {transform_indices = @transform_5, window_bounds = array<i64: 4, 128>}]} {
    %c0 = arith.constant 0 : index
    %c0_0 = arith.constant 0 : index
    %0 = vector.load %arg1[%c0, %c0_0] : memref<4x768xf32, #tpu.memory_space<vmem>>, vector<4x768xf32>
    %1 = arith.truncf %0 : vector<4x768xf32> to vector<4x768xbf16>
    %c0_1 = arith.constant 0 : index
    %c0_2 = arith.constant 0 : index
    %2 = vector.load %arg2[%c0_1, %c0_2] : memref<768x256xbf16, #tpu.memory_space<vmem>>, vector<768x256xbf16>
    %cst = arith.constant dense<0.000000e+00> : vector<4x256xf32>
    %3 = tpu.matmul %1, %2, %cst {dimension_numbers = #tpu.dot_dimension_numbers<[1], [0], [0], [1], [0, 0, 1, 1], [], []>} : vector<4x768xbf16>, vector<768x256xbf16>, vector<4x256xf32> -> vector<4x256xf32>
    %c0_3 = arith.constant 0 : index
    %c0_4 = arith.constant 0 : index
    %4 = vector.load %arg3[%c0_3, %c0_4] : memref<1x256xf32, #tpu.memory_space<vmem>>, vector<1x256xf32>
    %5 = vector.broadcast %4 : vector<1x256xf32> to vector<4x256xf32>
    %6 = arith.addf %3, %5 : vector<4x256xf32>
    %cst_5 = arith.constant 0.000000e+00 : f32
    %7 = vector.broadcast %cst_5 : f32 to vector<4x256xf32>
    %8 = arith.maximumf %6, %7 : vector<4x256xf32>
    %9 = arith.truncf %8 : vector<4x256xf32> to vector<4x256xbf16>
    %c0_6 = arith.constant 0 : index
    %c0_7 = arith.constant 0 : index
    %10 = vector.load %arg4[%c0_6, %c0_7] : memref<256x128xbf16, #tpu.memory_space<vmem>>, vector<256x128xbf16>
    %cst_8 = arith.constant dense<0.000000e+00> : vector<4x128xf32>
    %11 = tpu.matmul %9, %10, %cst_8 {dimension_numbers = #tpu.dot_dimension_numbers<[1], [0], [0], [1], [0, 0, 1, 1], [], []>} : vector<4x256xbf16>, vector<256x128xbf16>, vector<4x128xf32> -> vector<4x128xf32>
    %c0_9 = arith.constant 0 : index
    %c0_10 = arith.constant 0 : index
    %12 = vector.load %arg5[%c0_9, %c0_10] : memref<1x128xf32, #tpu.memory_space<vmem>>, vector<1x128xf32>
    %13 = vector.broadcast %12 : vector<1x128xf32> to vector<4x128xf32>
    %14 = arith.addf %11, %13 : vector<4x128xf32>
    %c0_11 = arith.constant 0 : index
    %c0_12 = arith.constant 0 : index
    %15 = vector.load %arg6[%c0_11, %c0_12] : memref<4x128xf32, #tpu.memory_space<vmem>>, vector<4x128xf32>
    tpu.vector_store %arg6[%c0_11, %c0_12], %14 {strides = array<i32>} : memref<4x128xf32, #tpu.memory_space<vmem>>, vector<4x128xf32>,
    return
  }
  func.func @transform_0(%arg0: i32) -> (i32, i32) {
    %c0_i32 = arith.constant 0 : i32
    %c0_i32_0 = arith.constant 0 : i32
    return %arg0, %c0_i32 : i32, i32
  }
  func.func @transform_1(%arg0: i32) -> (i32, i32) {
    %c0_i32 = arith.constant 0 : i32
    %c0_i32_0 = arith.constant 0 : i32
    %c0_i32_1 = arith.constant 0 : i32
    return %c0_i32, %c0_i32_0 : i32, i32
  }
  func.func @transform_2(%arg0: i32) -> (i32, i32) {
    %c0_i32 = arith.constant 0 : i32
    %c0_i32_0 = arith.constant 0 : i32
    %c0_i32_1 = arith.constant 0 : i32
    return %c0_i32, %c0_i32_0 : i32, i32
  }
  func.func @transform_3(%arg0: i32) -> (i32, i32) {
    %c0_i32 = arith.constant 0 : i32
    %c0_i32_0 = arith.constant 0 : i32
    %c0_i32_1 = arith.constant 0 : i32
    return %c0_i32, %c0_i32_0 : i32, i32
  }
  func.func @transform_4(%arg0: i32) -> (i32, i32) {
    %c0_i32 = arith.constant 0 : i32
    %c0_i32_0 = arith.constant 0 : i32
    %c0_i32_1 = arith.constant 0 : i32
    return %c0_i32, %c0_i32_0 : i32, i32
  }
  func.func @transform_5(%arg0: i32) -> (i32, i32) {
    %c0_i32 = arith.constant 0 : i32
    %c0_i32_0 = arith.constant 0 : i32
    return %arg0, %c0_i32 : i32, i32
  }
}

</mosaic_0001>

<bundles_post_ra>
// kernel: tpu_custom_call.1
= control target key start
LH: loop header
LB: loop body
LE: loop exit
PB: predicated region body
PF: predicated region fallthrough
CT: control target
= control target key end

     0   :  { %10 = vsyncpa [#allocation3], 0  ;;  %s1440_s0 = inlined_call_operand.hbm [shape: f32[4,768], index: 0, kind: input, shape index: {}]   ;;  %s1441_s1 = inlined_call_operand.hbm [shape: bf16[768,256], index: 1, kind: input, shape index: {}]   ;;  %s1442_s2 = inlined_call_operand.vmem [shape: f32[1,256], index: 2, kind: input, shape index: {}]   ;;  %s1443_s3 = inlined_call_operand.hbm [shape: bf16[256,128], index: 3, kind: input, shape index: {}]   ;;  %s1444_s4 = inlined_call_operand.vmem [shape: f32[1,128], index: 4, kind: input, shape index: {}]   ;;  %s1445_s5 = inlined_call_operand.hbm [shape: f32[4,128], index: 5, kind: output, shape index: {}]  }
   0x1   :  { %11 = vsyncpa [#allocation6], 0 }
   0x2   :  { %12 = vsyncpa [#allocation4], 0  ;;  %s1378_s18 = smov [#allocation5]  }
   0x3   :  { %s28_s19 = sshll.u32 %s1378_s18, 4  ;;  %s29_s19 = int_to_ptr.vmem [resolvable:$true] %s28_s19 }
   0x4   :  { %s1300_s20 = scalar_lea.vmem %s29_s19, 12288  ;;  %p1305_p1 = scmp.lt.s32.totalorder %s29_s19, %s29_s19 }
   0x5   :  { %p1301_p0 = scmp.ne.s32.totalorder %s29_s19, %s1300_s20  ;;  %p1306_p2 = scmp.lt.s32.totalorder %s1300_s20, %s1300_s20 }
   0x7   :  { %p1307_p3 = por %p1306_p2, %p1305_p1 }
   0x9   :  { %p1308_p4 = pnand %p1307_p3, %p1301_p0 }
   0xb   :  { %1311 = shalt.err (!%p1308_p4)
}
   0xc   :  { %s1379_s21 = smov 128   ;;  %s1380_s22 = smov 8  }
   0xd   :  { %34 = dma.hbm_to_vmem [thread:$0]  %s1441_s1, 12288, %s29_s19, [#allocation6], %s1379_s21, %s1379_s21, %s1380_s22  }
   0xe   :  { %s1381_s25 = smov [#allocation2]   ;;  %s1382_s27 = smov [#allocation7]  }
   0xf   :  { %s19_s26 = sshll.u32 %s1381_s25, 4  ;;  %s42_s28 = sshll.u32 %s1382_s27, 4  ;;  %s20_s26 = int_to_ptr.vmem [resolvable:$true] %s19_s26  ;;  %s43_s28 = int_to_ptr.vmem [resolvable:$true] %s42_s28 }
  0x10   :  { %s1320_s29 = scalar_lea.vmem %s20_s26, 384  ;;  %p1325_p6 = scmp.lt.s32.totalorder %s20_s26, %s20_s26 }
  0x11   :  { %p1321_p5 = scmp.ne.s32.totalorder %s20_s26, %s1320_s29  ;;  %p1326_p7 = scmp.lt.s32.totalorder %s1320_s29, %s1320_s29 }
  0x13   :  { %p1327_p8 = por %p1326_p7, %p1325_p6 }
  0x15   :  { %p1328_p9 = pnand %p1327_p8, %p1321_p5 }
  0x17   :  { %1331 = shalt.err (!%p1328_p9)
}
  0x18   :  { %22 = dma.hbm_to_vmem [thread:$0]  %s1440_s0, 384, %s20_s26, [#allocation3]  }
  0x19   :  { %s1340_s7 = scalar_lea.vmem %s43_s28, 2048  ;;  %p1345_p11 = scmp.lt.s32.totalorder %s43_s28, %s43_s28 }
  0x1a   :  { %p1341_p10 = scmp.ne.s32.totalorder %s43_s28, %s1340_s7  ;;  %p1346_p12 = scmp.lt.s32.totalorder %s1340_s7, %s1340_s7 }
  0x1c   :  { %p1347_p13 = por %p1346_p12, %p1345_p11 }
  0x1e   :  { %p1348_p0 = pnand %p1347_p13, %p1341_p10 }
  0x20   :  { %1351 = shalt.err (!%p1348_p0)
}
  0x21   :  { %s1383_s1 = smov 64   ;;  %s1384_s8 = smov 4  }
  0x22   :  { %48 = dma.hbm_to_vmem [thread:$0]  %s1443_s3, 2048, %s43_s28, [#allocation6], %s1383_s1, %s1383_s1, %s1384_s8  }
  0x23   :  { %1372 = dma.done.wait [#allocation3], 384  }
  0x24   :  { %1373 = vsyncadd [#allocation3], 4294966912 }
  0x25   :  { %1374 = dma.done.wait [#allocation6], 14336  }
  0x26   :  { %1375 = vsyncadd [#allocation6], 4294952960  ;;  %v1129_v0 = vld [vmem:[#allocation5 + $0x74] ss:$8 sps:$4 sm:$0xff]   ;;  %v1131_v1 = vld [vmem:[#allocation5 + $0x70] ss:$8 sps:$4 sm:$0xff]  }
  0x27   :  { %667 = vmatprep.subr.bf16.mxu0 %v1129_v0  ;;  %v1132_v2 = vld [vmem:[#allocation5 + $0x174] ss:$8 sps:$4 sm:$0xff]   ;;  %v1134_v3 = vld [vmem:[#allocation5 + $0x170] ss:$8 sps:$4 sm:$0xff]   ;;  %v1135_v4 = vld [vmem:[#allocation5 + $0x64] ss:$8 sps:$4 sm:$0xff]  }
  0x28   :  { %668 = vmatpush1.bf16.msra.mxu0 %v1131_v1  ;;  %v1137_v5 = vld [vmem:[#allocation5 + $0x60] ss:$8 sps:$4 sm:$0xff]   ;;  %708 = vmatprep.subr.bf16.mxu1 %v1132_v2  ;;  %v1138_v6 = vld [vmem:[#allocation5 + $0x164] ss:$8 sps:$4 sm:$0xff]   ;;  %v1141_v8 = vld [vmem:[#allocation5 + $0x54] ss:$8 sps:$4 sm:$0xff]  }
  0x29   :  { %709 = vmatpush1.bf16.msra.mxu1 %v1134_v3  ;;  %669 = vmatprep.subr.bf16.mxu0 %v1135_v4  ;;  %v1140_v7 = vld [vmem:[#allocation5 + $0x160] ss:$8 sps:$4 sm:$0xff]   ;;  %v1143_v9 = vld [vmem:[#allocation5 + $0x50] ss:$8 sps:$4 sm:$0xff]   ;;  %v1144_v10 = vld [vmem:[#allocation5 + $0x154] ss:$8 sps:$4 sm:$0xff]  }
  0x2a   :  { %710 = vmatprep.subr.bf16.mxu1 %v1138_v6  ;;  %v1147_v11 = vld [vmem:[#allocation5 + $0x44] ss:$8 sps:$4 sm:$0xff]   ;;  %v1146_v12 = vld [vmem:[#allocation5 + $0x150] ss:$8 sps:$4 sm:$0xff]   ;;  %v1149_v14 = vld [vmem:[#allocation5 + $0x40] ss:$8 sps:$4 sm:$0xff]  }
  0x2b   :  { %v1150_v13 = vld [vmem:[#allocation5 + $0x144] ss:$8 sps:$4 sm:$0xff]   ;;  %v1153_v15 = vld [vmem:[#allocation5 + $0x34] ss:$8 sps:$4 sm:$0xff]   ;;  %v1152_v16 = vld [vmem:[#allocation5 + $0x140] ss:$8 sps:$4 sm:$0xff]  }
  0x2c   :  { %670 = vmatpush1.bf16.msra.mxu0 %v1137_v5  ;;  %v1156_v17 = vld [vmem:[#allocation5 + $0x134] ss:$8 sps:$4 sm:$0xff]   ;;  %v1155_v18 = vld [vmem:[#allocation5 + $0x30] ss:$8 sps:$4 sm:$0xff]   ;;  %v1159_v19 = vld [vmem:[#allocation5 + $0x24] ss:$8 sps:$4 sm:$0xff]  }
  0x2d   :  { %671 = vmatprep.subr.bf16.mxu0 %v1141_v8  ;;  %711 = vmatpush1.bf16.msra.mxu1 %v1140_v7  ;;  %v1158_v20 = vld [vmem:[#allocation5 + $0x130] ss:$8 sps:$4 sm:$0xff]   ;;  %v1162_v21 = vld [vmem:[#allocation5 + $0x124] ss:$8 sps:$4 sm:$0xff]   ;;  %v1161_v22 = vld [vmem:[#allocation5 + $0x20] ss:$8 sps:$4 sm:$0xff]  }
  0x2e   :  { %712 = vmatprep.subr.bf16.mxu1 %v1144_v10  ;;  %v1165_v23 = vld [vmem:[#allocation5 + $0x14] ss:$8 sps:$4 sm:$0xff]   ;;  %v1164_v24 = vld [vmem:[#allocation5 + $0x120] ss:$8 sps:$4 sm:$0xff]   ;;  %v1167_v26 = vld [vmem:[#allocation5 + $0x10] ss:$8 sps:$4 sm:$0xff]  }
  0x2f   :  { %v1168_v25 = vld [vmem:[#allocation5 + $0x114] ss:$8 sps:$4 sm:$0xff]   ;;  %v1171_v27 = vld [vmem:[#allocation5 + $0x4] ss:$8 sps:$4 sm:$0xff]   ;;  %v1170_v28 = vld [vmem:[#allocation5 + $0x110] ss:$8 sps:$4 sm:$0xff]  }
  0x30   :  { %672 = vmatpush1.bf16.msra.mxu0 %v1143_v9  ;;  %v1174_v29 = vld [vmem:[#allocation5 + $0x104] ss:$8 sps:$4 sm:$0xff]   ;;  %v1173_v30 = vld [vmem:[#allocation5] ss:$8 sps:$4 sm:$0xff]   ;;  %v1177_v31 = vld [vmem:[#allocation5 + $0xf4] ss:$8 sps:$4 sm:$0xff]  }
  0x31   :  { %673 = vmatprep.subr.bf16.mxu0 %v1147_v11  ;;  %713 = vmatpush1.bf16.msra.mxu1 %v1146_v12  ;;  %v1176_v32 = vld [vmem:[#allocation5 + $0x100] ss:$8 sps:$4 sm:$0xff]   ;;  %v1180_v33 = vld [vmem:[#allocation5 + $0x1f4] ss:$8 sps:$4 sm:$0xff]   ;;  %v1179_v34 = vld [vmem:[#allocation5 + $0xf0] ss:$8 sps:$4 sm:$0xff]  }
  0x32   :  { %714 = vmatprep.subr.bf16.mxu1 %v1150_v13  ;;  %v1183_v35 = vld [vmem:[#allocation5 + $0xe4] ss:$8 sps:$4 sm:$0xff]   ;;  %v1182_v36 = vld [vmem:[#allocation5 + $0x1f0] ss:$8 sps:$4 sm:$0xff]   ;;  %v1185_v38 = vld [vmem:[#allocation5 + $0xe0] ss:$8 sps:$4 sm:$0xff]  }
  0x33   :  { %v1186_v37 = vld [vmem:[#allocation5 + $0x1e4] ss:$8 sps:$4 sm:$0xff]   ;;  %v1189_v39 = vld [vmem:[#allocation5 + $0xd4] ss:$8 sps:$4 sm:$0xff]   ;;  %v1188_v40 = vld [vmem:[#allocation5 + $0x1e0] ss:$8 sps:$4 sm:$0xff]  }
  0x34   :  { %674 = vmatpush1.bf16.msra.mxu0 %v1149_v14  ;;  %v1192_v41 = vld [vmem:[#allocation5 + $0x1d4] ss:$8 sps:$4 sm:$0xff]   ;;  %v1191_v42 = vld [vmem:[#allocation5 + $0xd0] ss:$8 sps:$4 sm:$0xff]   ;;  %v1195_v43 = vld [vmem:[#allocation5 + $0xc4] ss:$8 sps:$4 sm:$0xff]  }
  0x35   :  { %675 = vmatprep.subr.bf16.mxu0 %v1153_v15  ;;  %715 = vmatpush1.bf16.msra.mxu1 %v1152_v16  ;;  %v1194_v44 = vld [vmem:[#allocation5 + $0x1d0] ss:$8 sps:$4 sm:$0xff]   ;;  %v1198_v45 = vld [vmem:[#allocation5 + $0x1c4] ss:$8 sps:$4 sm:$0xff]   ;;  %v1197_v47 = vld [vmem:[#allocation5 + $0xc0] ss:$8 sps:$4 sm:$0xff]  }
  0x36   :  { %716 = vmatprep.subr.bf16.mxu1 %v1156_v17  ;;  %v61_v46 = vld [vmem:[#allocation2] sm:$0xff]  ;;  %v1201_v49 = vld [vmem:[#allocation5 + $0xb4] ss:$8 sps:$4 sm:$0xff]   ;;  %v1203_v55 = vld [vmem:[#allocation5 + $0xb0] ss:$8 sps:$4 sm:$0xff]   ;;  %s1385_s12 = smov [#allocation8]  }
  0x37   :  { %v67_v48 = vcombine.high %v61_v46, %v61_v46  ;;  %v62_v50 = vld [vmem:[#allocation2 + $0x8] sm:$0xff]  ;;  %v1200_v51 = vld [vmem:[#allocation5 + $0x1c0] ss:$8 sps:$4 sm:$0xff]   ;;  %v1207_v57 = vld [vmem:[#allocation5 + $0xa4] ss:$8 sps:$4 sm:$0xff]   ;;  %v73_v7 = vpack.c.bf16 %v61_v46, %v61_v46  ;;  %s976_s13 = sshll.u32 %s1385_s12, 4  ;;  %s977_s13 = int_to_ptr.vmem [resolvable:$true] %s976_s13 }
  0x38   :  { %676 = vmatpush1.bf16.msra.mxu0 %v1155_v18  ;;  %v68_v53 = vcombine.high %v62_v50, %v62_v50  ;;  %v1204_v54 = vld [vmem:[#allocation5 + $0x1b4] ss:$8 sps:$4 sm:$0xff]   ;;  %v1206_v58 = vld [vmem:[#allocation5 + $0x1b0] ss:$8 sps:$4 sm:$0xff]   ;;  %v1210_v59 = vld [vmem:[#allocation5 + $0x1a4] ss:$8 sps:$4 sm:$0xff]   ;;  %v75_v9 = vpack.c.bf16 %v62_v50, %v62_v50  ;;  %p1357_p2 = scmp.lt.s32.totalorder %s977_s13, %s977_s13 }
  0x39   :  { %677 = vmatprep.subr.bf16.mxu0 %v1159_v19  ;;  %717 = vmatpush1.bf16.msra.mxu1 %v1158_v20  ;;  %v74_v52 = vpack.c.bf16 %v67_v48, %v67_v48  ;;  %v1209_v60 = vld [vmem:[#allocation5 + $0xa0] ss:$8 sps:$4 sm:$0xff]   ;;  %v1213_v61 = vld [vmem:[#allocation5 + $0x94] ss:$8 sps:$4 sm:$0xff]   ;;  %v1215_v0 = vld [vmem:[#allocation5 + $0x90] ss:$8 sps:$4 sm:$0xff]  }
  0x3a   :  { %718 = vmatprep.subr.bf16.mxu1 %v1162_v21  ;;  %v76_v56 = vpack.c.bf16 %v68_v53, %v68_v53  ;;  %v1212_v62 = vld [vmem:[#allocation5 + $0x1a0] ss:$8 sps:$4 sm:$0xff]   ;;  %v1216_v63 = vld [vmem:[#allocation5 + $0x194] ss:$8 sps:$4 sm:$0xff]   ;;  %v1219_v1 = vld [vmem:[#allocation5 + $0x84] ss:$8 sps:$4 sm:$0xff]  }
  0x3b   :  { %699 = vmatprep.mubr.bf16.mxu0 %v74_v52  ;;  %v1218_v2 = vld [vmem:[#allocation5 + $0x190] ss:$8 sps:$4 sm:$0xff]   ;;  %v1222_v3 = vld [vmem:[#allocation5 + $0x184] ss:$8 sps:$4 sm:$0xff]   ;;  %v1221_v4 = vld [vmem:[#allocation5 + $0x80] ss:$8 sps:$4 sm:$0xff]  }
  0x3c   :  { %678 = vmatpush1.bf16.msra.mxu0 %v1161_v22  ;;  %740 = vmatprep.mubr.bf16.mxu1 %v76_v56  ;;  %v1228_v5 = vld [vmem:[#allocation5 + $0x274] ss:$8 sps:$4 sm:$0xff]   ;;  %v1225_v6 = vld [vmem:[#allocation5 + $0x180] ss:$8 sps:$4 sm:$0xff]   ;;  %v1226_v8 = vld [vmem:[#allocation5 + $0x270] ss:$8 sps:$4 sm:$0xff]  }
  0x3d   :  { %679 = vmatprep.subr.bf16.mxu0 %v1165_v23  ;;  %719 = vmatpush1.bf16.msra.mxu1 %v1164_v24  ;;  %v1232_v10 = vld [vmem:[#allocation5 + $0x264] ss:$8 sps:$4 sm:$0xff]   ;;  %v1425_v11 = vld [vmem:[#allocation2 + $0x10] sm:$0xff]  ;;  %v1230_v12 = vld [vmem:[#allocation5 + $0x260] ss:$8 sps:$4 sm:$0xff]   ;;  %s1352_s14 = scalar_lea.vmem %s977_s13, 64 }
  0x3e   :  { %720 = vmatprep.subr.bf16.mxu1 %v1168_v25  ;;  %v69_v13 = vcombine.high %v1425_v11, %v1425_v11  ;;  %v1235_v14 = vld [vmem:[#allocation5 + $0x254] ss:$8 sps:$4 sm:$0xff]   ;;  %v1233_v16 = vld [vmem:[#allocation5 + $0x250] ss:$8 sps:$4 sm:$0xff]   ;;  %v1238_v17 = vld [vmem:[#allocation5 + $0x244] ss:$8 sps:$4 sm:$0xff]   ;;  %p1353_p1 = scmp.ne.s32.totalorder %s977_s13, %s1352_s14  ;;  %p1358_p3 = scmp.lt.s32.totalorder %s1352_s14, %s1352_s14 }
  0x3f   :  { %v1236_v18 = vld [vmem:[#allocation5 + $0x240] ss:$8 sps:$4 sm:$0xff]   ;;  %v1241_v19 = vld [vmem:[#allocation5 + $0x234] ss:$8 sps:$4 sm:$0xff]   ;;  %v1239_v20 = vld [vmem:[#allocation5 + $0x230] ss:$8 sps:$4 sm:$0xff]  }
  0x40   :  { %680 = vmatpush1.bf16.msra.mxu0 %v1167_v26  ;;  %v78_v15 = vpack.c.bf16 %v69_v13, %v69_v13  ;;  %v1244_v21 = vld [vmem:[#allocation5 + $0x224] ss:$8 sps:$4 sm:$0xff]   ;;  %v1242_v22 = vld [vmem:[#allocation5 + $0x220] ss:$8 sps:$4 sm:$0xff]   ;;  %v1247_v23 = vld [vmem:[#allocation5 + $0x214] ss:$8 sps:$4 sm:$0xff]   ;;  %p1359_p4 = por %p1358_p3, %p1357_p2 }
  0x41   :  { %681 = vmatprep.subr.bf16.mxu0 %v1171_v27  ;;  %721 = vmatpush1.bf16.msra.mxu1 %v1170_v28  ;;  %v1245_v24 = vld [vmem:[#allocation5 + $0x210] ss:$8 sps:$4 sm:$0xff]   ;;  %v1250_v25 = vld [vmem:[#allocation5 + $0x204] ss:$8 sps:$4 sm:$0xff]   ;;  %v1248_v26 = vld [vmem:[#allocation5 + $0x200] ss:$8 sps:$4 sm:$0xff]  }
  0x42   :  { %722 = vmatprep.subr.bf16.mxu1 %v1174_v29  ;;  %v1253_v27 = vld [vmem:[#allocation5 + $0x2f4] ss:$8 sps:$4 sm:$0xff]   ;;  %v1251_v28 = vld [vmem:[#allocation5 + $0x2f0] ss:$8 sps:$4 sm:$0xff]   ;;  %v1256_v29 = vld [vmem:[#allocation5 + $0x2e4] ss:$8 sps:$4 sm:$0xff]   ;;  %p1360_p5 = pnand %p1359_p4, %p1353_p1 }
  0x43   :  { %v1278_v46 = vld [vmem:[#allocation7 + $0x70] sm:$0xff]   ;;  %v1280_v48 = vld [vmem:[#allocation7 + $0x68] sm:$0xff]   ;;  %v1282_v50 = vld [vmem:[#allocation7 + $0x60] sm:$0xff]  }
  0x44   :  { %682 = vmatpush1.bf16.msra.mxu0 %v1173_v30  ;;  %v1254_v30 = vld [vmem:[#allocation5 + $0x2e0] ss:$8 sps:$4 sm:$0xff]   ;;  %v1284_v52 = vld [vmem:[#allocation7 + $0x58] sm:$0xff]  }
  0x45   :  { %683 = vmatprep.subr.bf16.mxu0 %v1177_v31  ;;  %723 = vmatpush1.bf16.msra.mxu1 %v1176_v32  ;;  %v1259_v31 = vld [vmem:[#allocation5 + $0x2d4] ss:$8 sps:$4 sm:$0xff]   ;;  %v1257_v32 = vld [vmem:[#allocation5 + $0x2d0] ss:$8 sps:$4 sm:$0xff]   ;;  %v1288_v56 = vld [vmem:[#allocation7 + $0x48] sm:$0xff]  }
  0x46   :  { %724 = vmatprep.subr.bf16.mxu1 %v1180_v33  ;;  %v1262_v33 = vld [vmem:[#allocation5 + $0x2c4] ss:$8 sps:$4 sm:$0xff]   ;;  %v1285_v53 = vld [vmem:[#allocation7 + $0x18] sm:$0xff]  }
  0x48   :  { %684 = vmatpush2.bf16.msra.mxu0 %v1179_v34  ;;  %v1260_v34 = vld [vmem:[#allocation5 + $0x2c0] ss:$8 sps:$4 sm:$0xff]  }
  0x49   :  { %685 = vmatprep.subr.bf16.mxu0 %v1183_v35  ;;  %725 = vmatpush2.bf16.msra.mxu1 %v1182_v36  ;;  %v1265_v35 = vld [vmem:[#allocation5 + $0x2b4] ss:$8 sps:$4 sm:$0xff]   ;;  %v1263_v36 = vld [vmem:[#allocation5 + $0x2b0] ss:$8 sps:$4 sm:$0xff]  }
  0x4a   :  { %726 = vmatprep.subr.bf16.mxu1 %v1186_v37  ;;  %v1268_v37 = vld [vmem:[#allocation5 + $0x2a4] ss:$8 sps:$4 sm:$0xff]  }
  0x4c   :  { %686 = vmatpush2.bf16.msra.mxu0 %v1185_v38  ;;  %v1266_v38 = vld [vmem:[#allocation5 + $0x2a0] ss:$8 sps:$4 sm:$0xff]  }
  0x4d   :  { %687 = vmatprep.subr.bf16.mxu0 %v1189_v39  ;;  %727 = vmatpush2.bf16.msra.mxu1 %v1188_v40  ;;  %v1271_v39 = vld [vmem:[#allocation5 + $0x294] ss:$8 sps:$4 sm:$0xff]   ;;  %v1269_v40 = vld [vmem:[#allocation5 + $0x290] ss:$8 sps:$4 sm:$0xff]  }
  0x4e   :  { %728 = vmatprep.subr.bf16.mxu1 %v1192_v41  ;;  %v1274_v41 = vld [vmem:[#allocation5 + $0x284] ss:$8 sps:$4 sm:$0xff]  }
  0x50   :  { %688 = vmatpush2.bf16.msra.mxu0 %v1191_v42  ;;  %v1272_v42 = vld [vmem:[#allocation5 + $0x280] ss:$8 sps:$4 sm:$0xff]  }
  0x51   :  { %689 = vmatprep.subr.bf16.mxu0 %v1195_v43  ;;  %729 = vmatpush2.bf16.msra.mxu1 %v1194_v44  ;;  %v77_v43 = vpack.c.bf16 %v1425_v11, %v1425_v11  ;;  %v1276_v44 = vld [vmem:[#allocation7 + $0x78] sm:$0xff]  }
  0x52   :  { %730 = vmatprep.subr.bf16.mxu1 %v1198_v45  ;;  %v1277_v45 = vld [vmem:[#allocation7 + $0x38] sm:$0xff]  }
  0x54   :  { %690 = vmatpush2.bf16.msra.mxu0 %v1197_v47  ;;  %v1279_v47 = vld [vmem:[#allocation7 + $0x30] sm:$0xff]  }
  0x55   :  { %691 = vmatprep.subr.bf16.mxu0 %v1201_v49  ;;  %731 = vmatpush2.bf16.msra.mxu1 %v1200_v51  ;;  %v1281_v49 = vld [vmem:[#allocation7 + $0x28] sm:$0xff]   ;;  %v1283_v51 = vld [vmem:[#allocation7 + $0x20] sm:$0xff]  }
  0x56   :  { %732 = vmatprep.subr.bf16.mxu1 %v1204_v54  ;;  %v1286_v54 = vld [vmem:[#allocation7 + $0x50] sm:$0xff]  }
  0x58   :  { %692 = vmatpush2.bf16.msra.mxu0 %v1203_v55  ;;  %v1287_v55 = vld [vmem:[#allocation7 + $0x10] sm:$0xff]  }
  0x59   :  { %693 = vmatprep.subr.bf16.mxu0 %v1207_v57  ;;  %733 = vmatpush2.bf16.msra.mxu1 %v1206_v58  ;;  %v1289_v57 = vld [vmem:[#allocation7 + $0x8] sm:$0xff]   ;;  %v1290_v58 = vld [vmem:[#allocation7 + $0x40] sm:$0xff]  }
  0x5a   :  { %734 = vmatprep.subr.bf16.mxu1 %v1210_v59  ;;  %v1291_v59 = vld [vmem:[#allocation7] sm:$0xff]  }
  0x5c   :  { %694 = vmatpush2.bf16.msra.mxu0 %v1209_v60 }
  0x5d   :  { %695 = vmatprep.subr.bf16.mxu0 %v1213_v61  ;;  %735 = vmatpush2.bf16.msra.mxu1 %v1212_v62 }
  0x5e   :  { %736 = vmatprep.subr.bf16.mxu1 %v1216_v63 }
  0x60   :  { %696 = vmatpush2.bf16.msra.mxu0 %v1215_v0 }
  0x61   :  { %697 = vmatprep.subr.bf16.mxu0 %v1219_v1  ;;  %737 = vmatpush2.bf16.msra.mxu1 %v1218_v2 }
  0x62   :  { %738 = vmatprep.subr.bf16.mxu1 %v1222_v3 }
  0x64   :  { %698 = vmatpush2.bf16.msra.mxu0 %v1221_v4  ;;  %v177_v4 = vlaneseq }
  0x65   :  { %749 = vmatprep.subr.bf16.mxu0 %v1228_v5  ;;  %739 = vmatpush2.bf16.msra.mxu1 %v1225_v6 }
  0x66   :  { %1099 = vmatprep.subr.bf16.mxu1 %v1276_v44  ;;  %v178_v5 = vshrl.u32 %v177_v4, 7 }
  0x67   :  { %700 = vmatmul.mubr.bf16.vlgmr.msra.gmra.mxu0 %v73_v7  ;;  %v175_v7 = vld [vmem:[%s1442_s2] sm:$0x3] }
  0x68   :  { %750 = vmatpush1.bf16.msra.mxu0 %v1226_v8  ;;  %741 = vmatmul.mubr.bf16.vlgmr.msra.gmra.mxu1 %v75_v9  ;;  %v179_v6 = vsub.s32 0, %v178_v5  ;;  %v183_v8 = vsub.s32 1, %v178_v5 }
  0x69   :  { %751 = vmatprep.subr.bf16.mxu0 %v1232_v10  ;;  %781 = vmatprep.mubr.bf16.mxu0 %v78_v15 }
  0x6a   :  { %1100 = vmatpush3.bf16.msra.mxu1 %v1277_v45  ;;  %v180_v9 = vrot.slane %v175_v7, %v179_v6  ;;  %v184_v10 = vrot.slane %v175_v7, %v183_v8 }
  0x6b   :  { %1101 = vmatprep.subr.bf16.mxu1 %v1278_v46 }
  0x6c   :  { %752 = vmatpush1.bf16.msra.mxu0 %v1230_v12 }
  0x6d   :  { %753 = vmatprep.subr.bf16.mxu0 %v1235_v14 }
  0x6e   :  { %1102 = vmatpush3.bf16.msra.mxu1 %v1279_v47 }
  0x6f   :  { %1103 = vmatprep.subr.bf16.mxu1 %v1280_v48 }
  0x70   :  { %754 = vmatpush1.bf16.msra.mxu0 %v1233_v16 }
  0x71   :  { %755 = vmatprep.subr.bf16.mxu0 %v1238_v17 }
  0x72   :  { %1104 = vmatpush3.bf16.msra.mxu1 %v1281_v49 }
  0x73   :  { %1105 = vmatprep.subr.bf16.mxu1 %v1282_v50 }
  0x74   :  { %756 = vmatpush1.bf16.msra.mxu0 %v1236_v18 }
  0x75   :  { %757 = vmatprep.subr.bf16.mxu0 %v1241_v19 }
  0x76   :  { %1106 = vmatpush3.bf16.msra.mxu1 %v1283_v51 }
  0x77   :  { %1107 = vmatprep.subr.bf16.mxu1 %v1284_v52 }
  0x78   :  { %758 = vmatpush1.bf16.msra.mxu0 %v1239_v20 }
  0x79   :  { %759 = vmatprep.subr.bf16.mxu0 %v1244_v21 }
  0x7a   :  { %1108 = vmatpush3.bf16.msra.mxu1 %v1285_v53 }
  0x7b   :  { %1109 = vmatprep.subr.bf16.mxu1 %v1286_v54 }
  0x7c   :  { %760 = vmatpush1.bf16.msra.mxu0 %v1242_v22 }
  0x7d   :  { %761 = vmatprep.subr.bf16.mxu0 %v1247_v23 }
  0x7e   :  { %1110 = vmatpush3.bf16.msra.mxu1 %v1287_v55 }
  0x7f   :  { %1111 = vmatprep.subr.bf16.mxu1 %v1288_v56 }
  0x80   :  { %762 = vmatpush1.bf16.msra.mxu0 %v1245_v24 }
  0x81   :  { %763 = vmatprep.subr.bf16.mxu0 %v1250_v25 }
  0x82   :  { %1112 = vmatpush3.bf16.msra.mxu1 %v1289_v57 }
  0x83   :  { %1113 = vmatprep.subr.bf16.mxu1 %v1290_v58 }
  0x84   :  { %764 = vmatpush1.bf16.msra.mxu0 %v1248_v26  ;;  %v1082_v26 = vld [vmem:[%s1444_s4] ss:$0 sm:$0xff] }
  0x85   :  { %765 = vmatprep.subr.bf16.mxu0 %v1253_v27 }
  0x86   :  { %1114 = vmatpush3.bf16.msra.mxu1 %v1291_v59 }
  0x88   :  { %766 = vmatpush2.bf16.msra.mxu0 %v1251_v28 }
  0x89   :  { %767 = vmatprep.subr.bf16.mxu0 %v1256_v29 }
  0x8c   :  { %768 = vmatpush2.bf16.msra.mxu0 %v1254_v30 }
  0x8d   :  { %769 = vmatprep.subr.bf16.mxu0 %v1259_v31 }
  0x90   :  { %770 = vmatpush2.bf16.msra.mxu0 %v1257_v32 }
  0x91   :  { %771 = vmatprep.subr.bf16.mxu0 %v1262_v33 }
  0x94   :  { %772 = vmatpush2.bf16.msra.mxu0 %v1260_v34 }
  0x95   :  { %773 = vmatprep.subr.bf16.mxu0 %v1265_v35 }
  0x98   :  { %774 = vmatpush2.bf16.msra.mxu0 %v1263_v36 }
  0x99   :  { %775 = vmatprep.subr.bf16.mxu0 %v1268_v37 }
  0x9c   :  { %776 = vmatpush2.bf16.msra.mxu0 %v1266_v38 }
  0x9d   :  { %777 = vmatprep.subr.bf16.mxu0 %v1271_v39 }
  0xa0   :  { %778 = vmatpush2.bf16.msra.mxu0 %v1269_v40 }
  0xa1   :  { %779 = vmatprep.subr.bf16.mxu0 %v1274_v41 }
  0xa4   :  { %780 = vmatpush2.bf16.msra.mxu0 %v1272_v42 }
  0xa7   :  { %782 = vmatmul.mubr.bf16.vlgmr.msra.gmra.mxu0 %v77_v43 }
 0x127   :  { %v701_v60 = vpop.f32.mrf.mxu0 }
 0x128   :  { %v742_v62 = vpop.f32.mrf.mxu1  ;;  %v702_v11 = vadd.f32 %v701_v60, %v180_v9 }
 0x129   :  { %v703_v61 = vpop.f32.mrf.mxu0 }
 0x12a   :  { %v744_v0 = vpop.f32.mrf.mxu1  ;;  %v704_v12 = vadd.f32 %v703_v61, %v184_v10  ;;  %v743_v13 = vadd.f32 %v742_v62, %v702_v11 }
 0x12b   :  { %v705_v63 = vpop.f32.mrf.mxu0 }
 0x12c   :  { %v746_v2 = vpop.f32.mrf.mxu1  ;;  %v745_v15 = vadd.f32 %v744_v0, %v704_v12 }
 0x12d   :  { %v706_v1 = vpop.f32.mrf.mxu0 }
 0x12e   :  { %v747_v3 = vpop.f32.mrf.mxu1 }
 0x167   :  { %v783_v14 = vpop.f32.mrf.mxu0 }
 0x168   :  { %v784_v16 = vadd.f32 %v783_v14, %v743_v13 }
 0x169   :  { %v785_v17 = vpop.f32.mrf.mxu0 }
 0x16a   :  { %v786_v18 = vadd.f32 %v785_v17, %v745_v15  ;;  %v790_v19 = vmax.f32 %v784_v16, 0.0 }
 0x16b   :  { %v787_v20 = vpop.f32.mrf.mxu0 }
 0x16c   :  { %v791_v21 = vmax.f32 %v786_v18, 0.0  ;;  %v792_v24 = vpack.c.bf16 %v790_v19, %v790_v19 }
 0x16d   :  { %v788_v22 = vpop.f32.mrf.mxu0 }
 0x16e   :  { %v793_v23 = vpack.c.bf16 %v791_v21, %v791_v21 }
 0x170   :  { %961 = vmatprep.mubr.bf16.mxu1 %v793_v23 }
 0x171   :  { %962 = vmatmul.mubr.bf16.vlgmr.msra.gmra.mxu1 %v792_v24 }
 0x231   :  { %v1115_v25 = vpop.f32.mrf.mxu1 }
 0x233   :  { %v1116_v27 = vpop.f32.mrf.mxu1 }
 0x234   :  { %v1117_v28 = vadd.f32 %v1116_v27, %v1115_v25 }
 0x235   :  { %v1118_v29 = vpop.f32.mrf.mxu1 }
 0x236   :  { %v964_v30 = vadd.f32 %v1117_v28, %v1082_v26 }
 0x237   :  { %v1119_v31 = vpop.f32.mrf.mxu1 }
 0x238   :  { %969 = vst [vmem:[#allocation8] sm:$0xf] %v964_v30 }
 0x239   :  { %1363 = shalt.err (!%p1360_p5)
}
 0x23a   :  { %979 = dma.vmem_to_hbm [thread:$0]  %s977_s13, 64, %s1445_s5, [#allocation4]  }
 0x23b   :  { %1376 = dma.done.wait [#allocation4], 64  }
 0x23c   :  { %1377 = vsyncadd [#allocation4], 4294967232 }
 0x23d   :  { %983 = vsyncpa [#allocation3], 1 }
 0x23e   :  { %984 = vsyncpa [#allocation6], 1 }
 0x23f   :  { %985 = vsyncpa [#allocation4], 1 }

</bundles_post_ra>
